<compile_context>
chip_gen: v5e
topology: v5e:2x2
jax: 0.10.0
libtpu: 0.0.40
codegen_flags: <defaults>
</compile_context>

<pallas_src>
import functools
import math

import jax
import jax.numpy as jnp
from jax.experimental import pallas as pl
from jax.experimental.pallas import tpu as pltpu


def _round_up(x, m):
    return ((x + m - 1) // m) * m


# -----------------------------------------------------------------------------
# Kernels
# -----------------------------------------------------------------------------
def _noisy_linear_train_kernel(x_ref, wmu_ref, wsig_ref, ein_ref, eout_ref,
                               bmu_ref, bsig_ref, beps_ref, o_ref, acc_sig_ref):
    """grid = (B/tm, out/tn, in/tk); reduction axis (in) is last.

    y = x @ wmu + eps_out * ((x * eps_in) @ wsig) + (bias_mu + bias_sigma*bias_eps)
    with weights stored (in, out) so the MXU sees the canonical contraction.
    """
    k = pl.program_id(2)

    @pl.when(k == 0)
    def _():
        o_ref[...] = jnp.zeros_like(o_ref)           # mu accumulator (f32 out)
        acc_sig_ref[...] = jnp.zeros_like(acc_sig_ref)

    x = x_ref[...]                                     # (tm, tk) f32
    xe = x * ein_ref[...]                              # (tm, tk) * (1, tk), f32 VPU
    wmu = wmu_ref[...]                                 # (tk, tn) param dtype
    wsig = wsig_ref[...]                               # (tk, tn) param dtype
    cdt = wmu.dtype                                    # f32 or bf16 MXU operands

    o_ref[...] += jnp.dot(x.astype(cdt), wmu,
                          preferred_element_type=jnp.float32)
    acc_sig_ref[...] += jnp.dot(xe.astype(cdt), wsig,
                                preferred_element_type=jnp.float32)

    @pl.when(k == pl.num_programs(2) - 1)
    def _():
        bias = bmu_ref[...] + bsig_ref[...] * beps_ref[...]          # (1, tn)
        o_ref[...] = o_ref[...] + eout_ref[...] * acc_sig_ref[...] + bias


def _linear_eval_kernel(x_ref, wmu_ref, bmu_ref, o_ref):
    """Eval path: plain linear with weight_mu / bias_mu only."""
    k = pl.program_id(2)

    @pl.when(k == 0)
    def _():
        o_ref[...] = jnp.zeros_like(o_ref)

    wmu = wmu_ref[...]
    o_ref[...] += jnp.dot(x_ref[...].astype(wmu.dtype), wmu,
                          preferred_element_type=jnp.float32)

    @pl.when(k == pl.num_programs(2) - 1)
    def _():
        o_ref[...] = o_ref[...] + bmu_ref[...]


# -----------------------------------------------------------------------------
# One-time parameter preparation (off the hot path)
# -----------------------------------------------------------------------------
def prepare_noisy_linear_params(weight_mu, weight_sigma, bias_mu, bias_sigma,
                                eps_in, eps_out, bias_epsilon=None, *,
                                param_dtype=jnp.float32,
                                tile_n=None, tile_k=None):
    """Transpose/pad/cast parameters once; reuse across forwards.

    weight_*: (out, in); bias_*: (out,); eps_in: (in,); eps_out: (out,).
    param_dtype=jnp.bfloat16 streams weights as bf16 (f32 accumulate) — halves
    weight HBM traffic; recommended default on v5e (bf16-only MXU).
    bias_epsilon defaults to eps_out (PyTorch reset_noise()).
    """
    out_f, in_f = weight_mu.shape
    if bias_epsilon is None:
        bias_epsilon = eps_out

    bpe_w = jnp.dtype(param_dtype).itemsize
    # Lane-aligned tiles, sized to actually use VMEM (per perf review).
    tn = _round_up(tile_n, 128) if tile_n else min(_round_up(out_f, 128), 512)
    tk = _round_up(tile_k, 128) if tile_k else min(
        _round_up(in_f, 128), 1024 if bpe_w == 4 else 2048)

    out_p = _round_up(out_f, tn)
    in_p = _round_up(in_f, tk)

    # v7x megacore: keep at least one "parallel" grid axis > 1 when the whole
    # batch fits a single tile, so the second TensorCore has work.
    if tile_n is None and out_p // tn == 1 and out_p >= 256 and (out_p // 2) % 128 == 0:
        tn = out_p // 2

    def pad2(a, rows, cols, dtype):
        a = a.astype(dtype)
        return jnp.pad(a, ((0, rows - a.shape[0]), (0, cols - a.shape[1])))

    # Weights stored (in, out): canonical MXU contraction, no in-kernel transpose.
    wmu_t = pad2(weight_mu.T, in_p, out_p, param_dtype)
    wsig_t = pad2(weight_sigma.T, in_p, out_p, param_dtype)
    # Small vectors stay f32 (precision is free here).
    ein = pad2(eps_in.reshape(1, in_f), 1, in_p, jnp.float32)
    eout = pad2(eps_out.reshape(1, out_f), 1, out_p, jnp.float32)
    bmu = pad2(bias_mu.reshape(1, out_f), 1, out_p, jnp.float32)
    bsig = pad2(bias_sigma.reshape(1, out_f), 1, out_p, jnp.float32)
    beps = pad2(bias_epsilon.reshape(1, out_f), 1, out_p, jnp.float32)

    # NOTE: on v7x one could additionally stream weights as fp8 to halve DMA
    # again; left as an opt-in quality/perf tradeoff (not enabled here).
    return dict(wmu_t=wmu_t, wsig_t=wsig_t, ein=ein, eout=eout,
                bmu=bmu, bsig=bsig, beps=beps,
                in_f=in_f, out_f=out_f, in_p=in_p, out_p=out_p,
                tn=tn, tk=tk, param_dtype=param_dtype)


# -----------------------------------------------------------------------------
# Forward
# -----------------------------------------------------------------------------
def noisy_linear_forward(x, params, *, training=True, tile_m=None):
    """x: (B, in). Returns (B, out) f32. `params` from prepare_noisy_linear_params."""
    B, in_f = x.shape
    assert in_f == params["in_f"], "x feature dim mismatch"
    out_f, in_p, out_p = params["out_f"], params["in_p"], params["out_p"]
    tn, tk = params["tn"], params["tk"]
    bpe_w = jnp.dtype(params["param_dtype"]).itemsize

    # Single batch block up to 512 rows -> weights streamed exactly once.
    tm = _round_up(tile_m, 8) if tile_m else min(_round_up(B, 8), 512)
    B_p = _round_up(B, tm)

    x_p = jnp.pad(x.astype(jnp.float32), ((0, B_p - B), (0, in_p - in_f)))

    grid = (B_p // tm, out_p // tn, in_p // tk)

    x_spec = pl.BlockSpec((tm, tk), lambda i, j, k: (i, k))
    w_spec = pl.BlockSpec((tk, tn), lambda i, j, k: (k, j))   # (in, out) layout
    row_k_spec = pl.BlockSpec((1, tk), lambda i, j, k: (0, k))  # eps_in
    row_n_spec = pl.BlockSpec((1, tn), lambda i, j, k: (0, j))  # eps_out / biases
    out_spec = pl.BlockSpec((tm, tn), lambda i, j, k: (i, j))

    # VMEM footprint (double-buffered inputs/outputs) -> explicit limit with margin.
    n_w = 2 if training else 1
    est_vmem = (2 * tm * tk * 4                    # x
                + n_w * 2 * tk * tn * bpe_w        # wmu (+ wsig)
                + 2 * tm * tn * 4                  # output block
                + (tm * tn * 4 if training else 0)  # sigma accumulator scratch
                + 16 * max(tk, tn) * 4)            # small row vectors
    vmem_limit = min(int(est_vmem * 1.3) + (4 << 20), 96 << 20)

    compiler_params = pltpu.CompilerParams(
        dimension_semantics=("parallel", "parallel", "arbitrary"),
        vmem_limit_bytes=vmem_limit)

    if training:
        cost = pl.CostEstimate(
            flops=4 * B_p * out_p * in_p,
            bytes_accessed=((B_p // tm) * 2 * in_p * out_p * bpe_w
                            + (out_p // tn) * B_p * in_p * 4
                            + B_p * out_p * 4 + 4 * (in_p + 5 * out_p)),
            transcendentals=0)
        y_p = pl.pallas_call(
            _noisy_linear_train_kernel,
            out_shape=jax.ShapeDtypeStruct((B_p, out_p), jnp.float32),
            grid_spec=pltpu.PrefetchScalarGridSpec(
                num_scalar_prefetch=0,
                grid=grid,
                in_specs=[x_spec, w_spec, w_spec, row_k_spec, row_n_spec,
                          row_n_spec, row_n_spec, row_n_spec],
                out_specs=out_spec,
                scratch_shapes=[pltpu.VMEM((tm, tn), jnp.float32)]),
            cost_estimate=cost,
            compiler_params=compiler_params,
        )(x_p, params["wmu_t"], params["wsig_t"], params["ein"], params["eout"],
          params["bmu"], params["bsig"], params["beps"])
    else:
        cost = pl.CostEstimate(
            flops=2 * B_p * out_p * in_p,
            bytes_accessed=((B_p // tm) * in_p * out_p * bpe_w
                            + (out_p // tn) * B_p * in_p * 4
                            + B_p * out_p * 4 + 4 * out_p),
            transcendentals=0)
        y_p = pl.pallas_call(
            _linear_eval_kernel,
            out_shape=jax.ShapeDtypeStruct((B_p, out_p), jnp.float32),
            grid_spec=pltpu.PrefetchScalarGridSpec(
                num_scalar_prefetch=0,
                grid=grid,
                in_specs=[x_spec, w_spec, row_n_spec],
                out_specs=out_spec),
            cost_estimate=cost,
            compiler_params=compiler_params,
        )(x_p, params["wmu_t"], params["bmu"])

    return y_p[:B, :out_f]


def noisy_linear(x, weight_mu, weight_sigma, eps_in, eps_out,
                 bias_mu, bias_sigma, bias_epsilon=None, *,
                 training=True, param_dtype=jnp.float32):
    """Convenience one-shot wrapper (prepares params every call).

    For hot paths, call prepare_noisy_linear_params() once and
    noisy_linear_forward() per step.
    """
    params = prepare_noisy_linear_params(
        weight_mu, weight_sigma, bias_mu, bias_sigma, eps_in, eps_out,
        bias_epsilon, param_dtype=param_dtype)
    return noisy_linear_forward(x, params, training=training)


# -----------------------------------------------------------------------------
# Parameter / noise construction (reset_parameters + reset_noise, plain JAX)
# -----------------------------------------------------------------------------
def _scale_noise(key, size):
    # torch: x = randn(size); x.sign() * x.abs().sqrt()
    x = jax.random.normal(key, (size,), dtype=jnp.float32)
    return jnp.sign(x) * jnp.sqrt(jnp.abs(x))


def init_noisy_linear_params(key, in_features, out_features, std_init=0.5):
    k_wmu, k_bmu, k_ein, k_eout = jax.random.split(key, 4)
    mu_range = 1.0 / math.sqrt(in_features)

    weight_mu = jax.random.uniform(
        k_wmu, (out_features, in_features), minval=-mu_range, maxval=mu_range,
        dtype=jnp.float32)
    weight_sigma = jnp.full((out_features, in_features), std_init * mu_range,
                            dtype=jnp.float32)
    bias_mu = jax.random.uniform(
        k_bmu, (out_features,), minval=-mu_range, maxval=mu_range,
        dtype=jnp.float32)
    bias_sigma = jnp.full((out_features,), std_init * mu_range,
                          dtype=jnp.float32)

    eps_in = _scale_noise(k_ein, in_features)     # factorized noise vectors
    eps_out = _scale_noise(k_eout, out_features)  # (bias_epsilon == eps_out)

    return dict(weight_mu=weight_mu, weight_sigma=weight_sigma,
                bias_mu=bias_mu, bias_sigma=bias_sigma,
                eps_in=eps_in, eps_out=eps_out)


if __name__ == "__main__":
    key = jax.random.PRNGKey(0)
    k_x, k_params = jax.random.split(key)

    batch, in_features, out_features = 8, 32, 64
    x = jax.random.normal(k_x, (batch, in_features), dtype=jnp.float32)
    p = init_noisy_linear_params(k_params, in_features, out_features)

    # f32 path: prepare once, run train + eval forwards.
    prep_f32 = prepare_noisy_linear_params(
        p["weight_mu"], p["weight_sigma"], p["bias_mu"], p["bias_sigma"],
        p["eps_in"], p["eps_out"])
    y_train = noisy_linear_forward(x, prep_f32, training=True)
    y_eval = noisy_linear_forward(x, prep_f32, training=False)

    # bf16 weight-streaming path (f32 accumulate) — the mem-bound fast path.
    prep_bf16 = prepare_noisy_linear_params(
        p["weight_mu"], p["weight_sigma"], p["bias_mu"], p["bias_sigma"],
        p["eps_in"], p["eps_out"], param_dtype=jnp.bfloat16)
    y_train_bf16 = noisy_linear_forward(x, prep_bf16, training=True)

    y_train, y_eval, y_train_bf16 = jax.block_until_ready(
        (y_train, y_eval, y_train_bf16))

    # Reference (PyTorch NoisyLinear semantics).
    w_eps = jnp.outer(p["eps_out"], p["eps_in"])
    w_ref = p["weight_mu"] + p["weight_sigma"] * w_eps
    b_ref = p["bias_mu"] + p["bias_sigma"] * p["eps_out"]
    y_ref_train = x @ w_ref.T + b_ref
    y_ref_eval = x @ p["weight_mu"].T + p["bias_mu"]

    assert y_train.shape == (batch, out_features)
    assert y_eval.shape == (batch, out_features)
    assert y_train_bf16.shape == (batch, out_features)
    assert jnp.allclose(y_train, y_ref_train, atol=1e-4, rtol=1e-4)
    assert jnp.allclose(y_eval, y_ref_eval, atol=1e-4, rtol=1e-4)
    assert jnp.allclose(y_train_bf16, y_ref_train, atol=5e-2, rtol=5e-2)

    print("KERNEL_OK")
</pallas_src>

<mosaic_0001>
module attributes {stable_mosaic.version = 11 : i64} {
  func.func @_noisy_linear_train_kernel(%arg0: i32, %arg1: i32, %arg2: i32, %arg3: memref<8x128xf32, #tpu.memory_space<vmem>>, %arg4: memref<128x128xf32, #tpu.memory_space<vmem>>, %arg5: memref<128x128xf32, #tpu.memory_space<vmem>>, %arg6: memref<1x128xf32, #tpu.memory_space<vmem>>, %arg7: memref<1x128xf32, #tpu.memory_space<vmem>>, %arg8: memref<1x128xf32, #tpu.memory_space<vmem>>, %arg9: memref<1x128xf32, #tpu.memory_space<vmem>>, %arg10: memref<1x128xf32, #tpu.memory_space<vmem>>, %arg11: memref<8x128xf32, #tpu.memory_space<vmem>>, %arg12: memref<8x128xf32, #tpu.memory_space<vmem>>) attributes {dimension_semantics = [#tpu.dimension_semantics<parallel>, #tpu.dimension_semantics<parallel>, #tpu.dimension_semantics<arbitrary>], iteration_bounds = array<i64: 1, 1, 1>, scalar_prefetch = 0 : i64, scratch_operands = 1 : i64, tpu.core_type = #tpu.core_type<tc>, window_params = [{transform_indices = @transform_0, window_bounds = array<i64: 8, 128>}, {transform_indices = @transform_1, window_bounds = array<i64: 128, 128>}, {transform_indices = @transform_2, window_bounds = array<i64: 128, 128>}, {transform_indices = @transform_3, window_bounds = array<i64: 1, 128>}, {transform_indices = @transform_4, window_bounds = array<i64: 1, 128>}, {transform_indices = @transform_5, window_bounds = array<i64: 1, 128>}, {transform_indices = @transform_6, window_bounds = array<i64: 1, 128>}, {transform_indices = @transform_7, window_bounds = array<i64: 1, 128>}, {transform_indices = @transform_8, window_bounds = array<i64: 8, 128>}]} {
    %c0_i32 = arith.constant 0 : i32
    %0 = arith.cmpi eq, %arg2, %c0_i32 : i32
    %1 = arith.extui %0 : i1 to i32
    %c0_i32_0 = arith.constant 0 : i32
    %2 = arith.cmpi ne, %1, %c0_i32_0 : i32
    scf.if %2 {
      %cst_19 = arith.constant 0.000000e+00 : f32
      %20 = vector.broadcast %cst_19 : f32 to vector<8x128xf32>
      %c0_20 = arith.constant 0 : index
      %c0_21 = arith.constant 0 : index
      %21 = vector.load %arg11[%c0_20, %c0_21] : memref<8x128xf32, #tpu.memory_space<vmem>>, vector<8x128xf32>
      tpu.vector_store %arg11[%c0_20, %c0_21], %20 {strides = array<i32>} : memref<8x128xf32, #tpu.memory_space<vmem>>, vector<8x128xf32>,
      %cst_22 = arith.constant 0.000000e+00 : f32
      %22 = vector.broadcast %cst_22 : f32 to vector<8x128xf32>
      %c0_23 = arith.constant 0 : index
      %c0_24 = arith.constant 0 : index
      %23 = vector.load %arg12[%c0_23, %c0_24] : memref<8x128xf32, #tpu.memory_space<vmem>>, vector<8x128xf32>
      tpu.vector_store %arg12[%c0_23, %c0_24], %22 {strides = array<i32>} : memref<8x128xf32, #tpu.memory_space<vmem>>, vector<8x128xf32>,
    } else {
    }
    %c0 = arith.constant 0 : index
    %c0_1 = arith.constant 0 : index
    %3 = vector.load %arg3[%c0, %c0_1] : memref<8x128xf32, #tpu.memory_space<vmem>>, vector<8x128xf32>
    %c0_2 = arith.constant 0 : index
    %c0_3 = arith.constant 0 : index
    %4 = vector.load %arg6[%c0_2, %c0_3] : memref<1x128xf32, #tpu.memory_space<vmem>>, vector<1x128xf32>
    %5 = vector.broadcast %4 : vector<1x128xf32> to vector<8x128xf32>
    %6 = arith.mulf %3, %5 : vector<8x128xf32>
    %c0_4 = arith.constant 0 : index
    %c0_5 = arith.constant 0 : index
    %7 = vector.load %arg4[%c0_4, %c0_5] : memref<128x128xf32, #tpu.memory_space<vmem>>, vector<128x128xf32>
    %c0_6 = arith.constant 0 : index
    %c0_7 = arith.constant 0 : index
    %8 = vector.load %arg5[%c0_6, %c0_7] : memref<128x128xf32, #tpu.memory_space<vmem>>, vector<128x128xf32>
    %c0_8 = arith.constant 0 : index
    %c0_9 = arith.constant 0 : index
    %9 = vector.load %arg11[%c0_8, %c0_9] : memref<8x128xf32, #tpu.memory_space<vmem>>, vector<8x128xf32>
    %cst = arith.constant dense<0.000000e+00> : vector<8x128xf32>
    %10 = tpu.matmul %3, %7, %cst {dimension_numbers = #tpu.dot_dimension_numbers<[1], [0], [0], [1], [0, 0, 1, 1], [], []>} : vector<8x128xf32>, vector<128x128xf32>, vector<8x128xf32> -> vector<8x128xf32>
    %11 = arith.addf %9, %10 : vector<8x128xf32>
    %c0_10 = arith.constant 0 : index
    %c0_11 = arith.constant 0 : index
    %12 = vector.load %arg11[%c0_10, %c0_11] : memref<8x128xf32, #tpu.memory_space<vmem>>, vector<8x128xf32>
    tpu.vector_store %arg11[%c0_10, %c0_11], %11 {strides = array<i32>} : memref<8x128xf32, #tpu.memory_space<vmem>>, vector<8x128xf32>,
    %c0_12 = arith.constant 0 : index
    %c0_13 = arith.constant 0 : index
    %13 = vector.load %arg12[%c0_12, %c0_13] : memref<8x128xf32, #tpu.memory_space<vmem>>, vector<8x128xf32>
    %cst_14 = arith.constant dense<0.000000e+00> : vector<8x128xf32>
    %14 = tpu.matmul %6, %8, %cst_14 {dimension_numbers = #tpu.dot_dimension_numbers<[1], [0], [0], [1], [0, 0, 1, 1], [], []>} : vector<8x128xf32>, vector<128x128xf32>, vector<8x128xf32> -> vector<8x128xf32>
    %15 = arith.addf %13, %14 : vector<8x128xf32>
    %c0_15 = arith.constant 0 : index
    %c0_16 = arith.constant 0 : index
    %16 = vector.load %arg12[%c0_15, %c0_16] : memref<8x128xf32, #tpu.memory_space<vmem>>, vector<8x128xf32>
    tpu.vector_store %arg12[%c0_15, %c0_16], %15 {strides = array<i32>} : memref<8x128xf32, #tpu.memory_space<vmem>>, vector<8x128xf32>,
    %c0_i32_17 = arith.constant 0 : i32
    %17 = arith.cmpi eq, %arg2, %c0_i32_17 : i32
    %18 = arith.extui %17 : i1 to i32
    %c0_i32_18 = arith.constant 0 : i32
    %19 = arith.cmpi ne, %18, %c0_i32_18 : i32
    scf.if %19 {
      %c0_19 = arith.constant 0 : index
      %c0_20 = arith.constant 0 : index
      %20 = vector.load %arg8[%c0_19, %c0_20] : memref<1x128xf32, #tpu.memory_space<vmem>>, vector<1x128xf32>
      %c0_21 = arith.constant 0 : index
      %c0_22 = arith.constant 0 : index
      %21 = vector.load %arg9[%c0_21, %c0_22] : memref<1x128xf32, #tpu.memory_space<vmem>>, vector<1x128xf32>
      %c0_23 = arith.constant 0 : index
      %c0_24 = arith.constant 0 : index
      %22 = vector.load %arg10[%c0_23, %c0_24] : memref<1x128xf32, #tpu.memory_space<vmem>>, vector<1x128xf32>
      %23 = arith.mulf %21, %22 : vector<1x128xf32>
      %24 = arith.addf %20, %23 : vector<1x128xf32>
      %c0_25 = arith.constant 0 : index
      %c0_26 = arith.constant 0 : index
      %25 = vector.load %arg11[%c0_25, %c0_26] : memref<8x128xf32, #tpu.memory_space<vmem>>, vector<8x128xf32>
      %c0_27 = arith.constant 0 : index
      %c0_28 = arith.constant 0 : index
      %26 = vector.load %arg7[%c0_27, %c0_28] : memref<1x128xf32, #tpu.memory_space<vmem>>, vector<1x128xf32>
      %c0_29 = arith.constant 0 : index
      %c0_30 = arith.constant 0 : index
      %27 = vector.load %arg12[%c0_29, %c0_30] : memref<8x128xf32, #tpu.memory_space<vmem>>, vector<8x128xf32>
      %28 = vector.broadcast %26 : vector<1x128xf32> to vector<8x128xf32>
      %29 = arith.mulf %28, %27 : vector<8x128xf32>
      %30 = arith.addf %25, %29 : vector<8x128xf32>
      %31 = vector.broadcast %24 : vector<1x128xf32> to vector<8x128xf32>
      %32 = arith.addf %30, %31 : vector<8x128xf32>
      %c0_31 = arith.constant 0 : index
      %c0_32 = arith.constant 0 : index
      %33 = vector.load %arg11[%c0_31, %c0_32] : memref<8x128xf32, #tpu.memory_space<vmem>>, vector<8x128xf32>
      tpu.vector_store %arg11[%c0_31, %c0_32], %32 {strides = array<i32>} : memref<8x128xf32, #tpu.memory_space<vmem>>, vector<8x128xf32>,
    } else {
    }
    return
  }
  func.func @transform_0(%arg0: i32, %arg1: i32, %arg2: i32) -> (i32, i32) {
    %c0_i32 = arith.constant 0 : i32
    return %arg0, %arg2 : i32, i32
  }
  func.func @transform_1(%arg0: i32, %arg1: i32, %arg2: i32) -> (i32, i32) {
    %c0_i32 = arith.constant 0 : i32
    return %arg2, %arg1 : i32, i32
  }
  func.func @transform_2(%arg0: i32, %arg1: i32, %arg2: i32) -> (i32, i32) {
    %c0_i32 = arith.constant 0 : i32
    return %arg2, %arg1 : i32, i32
  }
  func.func @transform_3(%arg0: i32, %arg1: i32, %arg2: i32) -> (i32, i32) {
    %c0_i32 = arith.constant 0 : i32
    %c0_i32_0 = arith.constant 0 : i32
    return %c0_i32, %arg2 : i32, i32
  }
  func.func @transform_4(%arg0: i32, %arg1: i32, %arg2: i32) -> (i32, i32) {
    %c0_i32 = arith.constant 0 : i32
    %c0_i32_0 = arith.constant 0 : i32
    return %c0_i32, %arg1 : i32, i32
  }
  func.func @transform_5(%arg0: i32, %arg1: i32, %arg2: i32) -> (i32, i32) {
    %c0_i32 = arith.constant 0 : i32
    %c0_i32_0 = arith.constant 0 : i32
    return %c0_i32, %arg1 : i32, i32
  }
  func.func @transform_6(%arg0: i32, %arg1: i32, %arg2: i32) -> (i32, i32) {
    %c0_i32 = arith.constant 0 : i32
    %c0_i32_0 = arith.constant 0 : i32
    return %c0_i32, %arg1 : i32, i32
  }
  func.func @transform_7(%arg0: i32, %arg1: i32, %arg2: i32) -> (i32, i32) {
    %c0_i32 = arith.constant 0 : i32
    %c0_i32_0 = arith.constant 0 : i32
    return %c0_i32, %arg1 : i32, i32
  }
  func.func @transform_8(%arg0: i32, %arg1: i32, %arg2: i32) -> (i32, i32) {
    %c0_i32 = arith.constant 0 : i32
    return %arg0, %arg1 : i32, i32
  }
}

</mosaic_0001>

<bundles_post_ra>
// kernel: tpu_custom_call.1
= control target key start
LH: loop header
LB: loop body
LE: loop exit
PB: predicated region body
PF: predicated region fallthrough
CT: control target
= control target key end

     0   :  { %13 = vsyncpa [#allocation4], 0  ;;  %s393_s0 = inlined_call_operand.hbm [shape: f32[8,128], index: 0, kind: input, shape index: {}]   ;;  %s394_s1 = inlined_call_operand.hbm [shape: f32[128,128], index: 1, kind: input, shape index: {}]   ;;  %s395_s2 = inlined_call_operand.hbm [shape: f32[128,128], index: 2, kind: input, shape index: {}]   ;;  %s396_s3 = inlined_call_operand.vmem [shape: f32[1,128], index: 3, kind: input, shape index: {}]   ;;  %s397_s4 = inlined_call_operand.vmem [shape: f32[1,128], index: 4, kind: input, shape index: {}]   ;;  %s398_s5 = inlined_call_operand.vmem [shape: f32[1,128], index: 5, kind: input, shape index: {}]   ;;  %s399_s6 = inlined_call_operand.vmem [shape: f32[1,128], index: 6, kind: input, shape index: {}]   ;;  %s400_s7 = inlined_call_operand.vmem [shape: f32[1,128], index: 7, kind: input, shape index: {}]   ;;  %s401_s8 = inlined_call_operand.hbm [shape: f32[8,128], index: 8, kind: output, shape index: {}]  }
   0x1   :  { %14 = vsyncpa [#allocation7], 0  ;;  %s31_s29 = sshll.u32 %s394_s1, 4  ;;  %s32_s29 = int_to_ptr.hbm [resolvable:$true] %s31_s29 }
   0x2   :  { %15 = vsyncpa [#allocation5], 0  ;;  %s315_s30 = smov [#allocation6]   ;;  %s21_s12 = sshll.u32 %s393_s0, 4  ;;  %s22_s12 = int_to_ptr.hbm [resolvable:$true] %s21_s12 }
   0x3   :  { %s33_s9 = sshll.u32 %s315_s30, 4  ;;  %s316_s13 = smov 128   ;;  %s34_s9 = int_to_ptr.vmem [resolvable:$true] %s33_s9 }
   0x4   :  { %s317_s14 = smov 8   ;;  %s318_s15 = smov [#allocation3]  }
   0x5   :  { %39 = dma.hbm_to_vmem [thread:$0]  %s32_s29, 2048, %s34_s9, [#allocation7], %s316_s13, %s316_s13, %s317_s14  }
   0x6   :  { %s23_s16 = sshll.u32 %s318_s15, 4  ;;  %s44_s19 = sshll.u32 %s395_s2, 4  ;;  %s24_s16 = int_to_ptr.vmem [resolvable:$true] %s23_s16  ;;  %s45_s19 = int_to_ptr.hbm [resolvable:$true] %s44_s19 }
   0x7   :  { %26 = dma.hbm_to_vmem [thread:$0]  %s22_s12, 128, %s24_s16, [#allocation4]  }
   0x8   :  { %s319_s1 = smov [#allocation8]  }
   0x9   :  { %s46_s20 = sshll.u32 %s319_s1, 4  ;;  %s47_s20 = int_to_ptr.vmem [resolvable:$true] %s46_s20 }
   0xa   :  { %52 = dma.hbm_to_vmem [thread:$0]  %s45_s19, 2048, %s47_s20, [#allocation7], %s316_s13, %s316_s13, %s317_s14  }
   0xb   :  { %309 = dma.done.wait [#allocation4], 128  }
   0xc   :  { %310 = vsyncadd [#allocation4], 4294967168 }
   0xd   :  { %311 = dma.done.wait [#allocation7], 4096  }
   0xe   :  { %312 = vsyncadd [#allocation7], 4294963200  ;;  %v102_v0 = vld [vmem:[#allocation6 + $0x78] sm:$0xff]  ;;  %v101_v1 = vld [vmem:[#allocation6 + $0x70] sm:$0xff]  ;;  %s320_s28 = smov [#allocation9]  }
   0xf   :  { %120 = vmatpush.msra.mxu0 %v102_v0  ;;  %v118_v2 = vld [vmem:[#allocation8 + $0x78] sm:$0xff]  ;;  %v100_v3 = vld [vmem:[#allocation6 + $0x68] sm:$0xff]  ;;  %v117_v4 = vld [vmem:[#allocation8 + $0x70] sm:$0xff] }
  0x10   :  { %143 = vmatpush.msra.mxu1 %v118_v2  ;;  %v116_v5 = vld [vmem:[#allocation8 + $0x68] sm:$0xff]  ;;  %v99_v6 = vld [vmem:[#allocation6 + $0x60] sm:$0xff]  ;;  %v98_v8 = vld [vmem:[#allocation6 + $0x58] sm:$0xff] }
  0x11   :  { %121 = vmatpush.msra.mxu0 %v101_v1  ;;  %v115_v7 = vld [vmem:[#allocation8 + $0x60] sm:$0xff]  ;;  %v114_v9 = vld [vmem:[#allocation8 + $0x58] sm:$0xff]  ;;  %v97_v10 = vld [vmem:[#allocation6 + $0x50] sm:$0xff] }
  0x12   :  { %144 = vmatpush.msra.mxu1 %v117_v4  ;;  %v113_v11 = vld [vmem:[#allocation8 + $0x50] sm:$0xff]  ;;  %v96_v12 = vld [vmem:[#allocation6 + $0x48] sm:$0xff]  ;;  %v95_v14 = vld [vmem:[#allocation6 + $0x40] sm:$0xff] }
  0x13   :  { %122 = vmatpush.msra.mxu0 %v100_v3  ;;  %v112_v13 = vld [vmem:[#allocation8 + $0x48] sm:$0xff]  ;;  %v111_v15 = vld [vmem:[#allocation8 + $0x40] sm:$0xff]  ;;  %v94_v16 = vld [vmem:[#allocation6 + $0x38] sm:$0xff] }
  0x14   :  { %145 = vmatpush.msra.mxu1 %v116_v5  ;;  %v110_v17 = vld [vmem:[#allocation8 + $0x38] sm:$0xff]  ;;  %v93_v18 = vld [vmem:[#allocation6 + $0x30] sm:$0xff]  ;;  %v92_v20 = vld [vmem:[#allocation6 + $0x28] sm:$0xff] }
  0x15   :  { %123 = vmatpush.msra.mxu0 %v99_v6  ;;  %v109_v19 = vld [vmem:[#allocation8 + $0x30] sm:$0xff]  ;;  %v108_v21 = vld [vmem:[#allocation8 + $0x28] sm:$0xff]  ;;  %v91_v22 = vld [vmem:[#allocation6 + $0x20] sm:$0xff] }
  0x16   :  { %146 = vmatpush.msra.mxu1 %v115_v7  ;;  %v107_v23 = vld [vmem:[#allocation8 + $0x20] sm:$0xff]  ;;  %v90_v24 = vld [vmem:[#allocation6 + $0x18] sm:$0xff]  ;;  %v89_v26 = vld [vmem:[#allocation6 + $0x10] sm:$0xff] }
  0x17   :  { %124 = vmatpush.msra.mxu0 %v98_v8  ;;  %v106_v25 = vld [vmem:[#allocation8 + $0x18] sm:$0xff]  ;;  %v105_v27 = vld [vmem:[#allocation8 + $0x10] sm:$0xff]  ;;  %v88_v29 = vld [vmem:[#allocation6 + $0x8] sm:$0xff] }
  0x18   :  { %147 = vmatpush.msra.mxu1 %v114_v9  ;;  %v211_v28 = vld [vmem:[%s396_s3] ss:$0 sm:$0xff]  ;;  %v104_v31 = vld [vmem:[#allocation8 + $0x8] sm:$0xff]  ;;  %v87_v32 = vld [vmem:[#allocation6] sm:$0xff] }
  0x19   :  { %125 = vmatpush.msra.mxu0 %v97_v10  ;;  %v81_v30 = vld [vmem:[#allocation3] sm:$0xff]  ;;  %v103_v33 = vld [vmem:[#allocation8] sm:$0xff] }
  0x1a   :  { %148 = vmatpush.msra.mxu1 %v113_v11  ;;  %v86_v34 = vmul.f32 %v211_v28, %v81_v30  ;;  %v169_v35 = vld [vmem:[%s399_s6] sm:$0x1]  ;;  %s191_s6 = sshll.u32 %s320_s28, 4  ;;  %s192_s6 = int_to_ptr.vmem [resolvable:$true] %s191_s6 }
  0x1b   :  { %126 = vmatpush.msra.mxu0 %v96_v12  ;;  %v170_v36 = vld [vmem:[%s400_s7] sm:$0x1]  ;;  %s193_s7 = sshll.u32 %s401_s8, 4  ;;  %s194_s7 = int_to_ptr.hbm [resolvable:$true] %s193_s7 }
  0x1c   :  { %149 = vmatpush.msra.mxu1 %v112_v13  ;;  %v171_v37 = vmul.f32 %v170_v36, %v169_v35  ;;  %v168_v38 = vld [vmem:[%s398_s5] sm:$0x1] }
  0x1d   :  { %127 = vmatpush.msra.mxu0 %v95_v14  ;;  %v212_v40 = vld [vmem:[%s397_s4] ss:$0 sm:$0xff] }
  0x1e   :  { %150 = vmatpush.msra.mxu1 %v111_v15  ;;  %v172_v39 = vadd.f32 %v171_v37, %v168_v38 }
  0x1f   :  { %128 = vmatpush.msra.mxu0 %v94_v16 }
  0x20   :  { %151 = vmatpush.msra.mxu1 %v110_v17  ;;  %v182_v44 = vperm.slane %v172_v39, 0 }
  0x21   :  { %129 = vmatpush.msra.mxu0 %v93_v18 }
  0x22   :  { %152 = vmatpush.msra.mxu1 %v109_v19 }
  0x23   :  { %130 = vmatpush.msra.mxu0 %v92_v20 }
  0x24   :  { %153 = vmatpush.msra.mxu1 %v108_v21 }
  0x25   :  { %131 = vmatpush.msra.mxu0 %v91_v22 }
  0x26   :  { %154 = vmatpush.msra.mxu1 %v107_v23 }
  0x27   :  { %132 = vmatpush.msra.mxu0 %v90_v24 }
  0x28   :  { %155 = vmatpush.msra.mxu1 %v106_v25 }
  0x29   :  { %133 = vmatpush.msra.mxu0 %v89_v26 }
  0x2a   :  { %156 = vmatpush.msra.mxu1 %v105_v27 }
  0x2b   :  { %134 = vmatpush.msra.mxu0 %v88_v29 }
  0x2c   :  { %157 = vmatpush.msra.mxu1 %v104_v31 }
  0x2d   :  { %135 = vmatpush.msra.mxu0 %v87_v32 }
  0x2e   :  { %136 = vmatmul.f32.vlgmr.msra.gmra.mxu0 %v81_v30  ;;  %158 = vmatpush.msra.mxu1 %v103_v33 }
  0x2f   :  { %159 = vmatmul.f32.vlgmr.msra.gmra.mxu1 %v86_v34 }
  0xab   :  { %v137_v41 = vpop.f32.mrf.mxu0 }
  0xac   :  { %v160_v42 = vpop.f32.mrf.mxu1 }
  0xad   :  { %v179_v43 = vmul.f32 %v212_v40, %v160_v42 }
  0xaf   :  { %v180_v45 = vadd.f32 %v179_v43, %v137_v41 }
  0xb1   :  { %v184_v46 = vadd.f32 %v182_v44, %v180_v45 }
  0xb3   :  { %185 = vst [vmem:[#allocation9] sm:$0xff] %v184_v46 }
  0xb4   :  { %196 = dma.vmem_to_hbm [thread:$0]  %s192_s6, 128, %s194_s7, [#allocation5]  }
  0xb5   :  { %313 = dma.done.wait [#allocation5], 128  }
  0xb6   :  { %314 = vsyncadd [#allocation5], 4294967168 }
  0xb7   :  { %201 = vsyncpa [#allocation4], 1 }
  0xb8   :  { %202 = vsyncpa [#allocation7], 1 }
  0xb9   :  { %203 = vsyncpa [#allocation5], 1 }

</bundles_post_ra>
